<compile_context>
chip_gen: v7x
topology: tpu7x:2x2x1
jax: 0.10.0
libtpu: 0.0.40
codegen_flags: <defaults>
</compile_context>

<pallas_src>
import math

import jax
import jax.numpy as jnp
from jax.experimental import pallas as pl
from jax.experimental.pallas import tpu as pltpu


def _patch_embed_kernel(x_ref, w_ref, o_ref):
    # x_ref: (tm, K) patch rows; w_ref: (K, tn) tile of W.T; o_ref: (tm, tn).
    # Single-shot K contraction (K is tiny), f32 accumulation on the MXU.
    o_ref[...] = jnp.dot(
        x_ref[...], w_ref[...], preferred_element_type=jnp.float32
    ).astype(o_ref.dtype)


def timer_patch_embedding(hidden_state: jnp.ndarray,
                          weight: jnp.ndarray,
                          input_token_len: int,
                          *,
                          compute_dtype=None,
                          max_tm: int = 1024,
                          max_tn: int = 512) -> jnp.ndarray:
    """hidden_state: (..., seq_len); weight: (hidden_size, input_token_len)
    returns: (..., num_patches, hidden_size)

    compute_dtype: optionally cast inputs (e.g. jnp.bfloat16) to halve HBM
    traffic; accumulation stays f32, output keeps hidden_state.dtype.
    """
    *lead, seq_len = hidden_state.shape
    if seq_len % input_token_len != 0:
        raise ValueError(
            f"seq_len ({seq_len}) must be divisible by input_token_len "
            f"({input_token_len})")
    num_patches = seq_len // input_token_len
    K = input_token_len
    N = weight.shape[0]

    M = num_patches
    for d in lead:
        M *= d

    out_dtype = hidden_state.dtype

    # Row-major flatten of (..., num_patches, K): free reshape.
    x2d = hidden_state.reshape(M, K)
    # TODO(synk): if this embedding is called repeatedly, pre-transpose the
    # weight once outside and pass (K, N) directly to skip this tiny XLA op.
    w_t = weight.T  # (K, N)

    if compute_dtype is not None:
        x2d = x2d.astype(compute_dtype)
        w_t = w_t.astype(compute_dtype)

    # Tile selection.
    #  - tm: full M if small (always legal as a full-extent block), else a
    #    large multiple of 8 to amortize per-grid-step overhead.
    #  - tn: full N if small, else a multiple of 128 so output stores are
    #    lane-dense (unmasked vst) and MXU tiles are unpadded.
    tm = M if M <= max_tm else max_tm
    tn = N if N <= max_tn else max_tn

    grid = (pl.cdiv(M, tm), pl.cdiv(N, tn))

    in_itemsize = jnp.dtype(x2d.dtype).itemsize
    out_itemsize = jnp.dtype(out_dtype).itemsize

    # Double-buffered per-step working set + headroom; keep well under the
    # v7x scoped/physical VMEM (32/64 MiB) while not starving larger tiles.
    step_bytes = 2 * (in_itemsize * (tm * K + K * tn) + out_itemsize * tm * tn)
    vmem_limit = int(min(64 * 1024 * 1024,
                         max(16 * 1024 * 1024, 2 * step_bytes)))

    cost = pl.CostEstimate(
        flops=2 * M * K * N,
        transcendentals=0,
        bytes_accessed=in_itemsize * (M * K + K * N) + out_itemsize * M * N,
    )

    out2d = pl.pallas_call(
        _patch_embed_kernel,
        out_shape=jax.ShapeDtypeStruct((M, N), out_dtype),
        grid_spec=pltpu.PrefetchScalarGridSpec(
            num_scalar_prefetch=0,
            grid=grid,
            in_specs=[
                # Activations: advance along M only.
                pl.BlockSpec((tm, K), lambda i, j: (i, 0)),
                # Weight tile: constant along M, advances along N only.
                pl.BlockSpec((K, tn), lambda i, j: (0, j)),
            ],
            out_specs=pl.BlockSpec((tm, tn), lambda i, j: (i, j)),
        ),
        compiler_params=pltpu.CompilerParams(
            # No reduction axis resident in the output -> both axes parallel;
            # lets v7x shard the grid across its 2 TensorCores.
            dimension_semantics=("parallel", "parallel"),
            vmem_limit_bytes=vmem_limit,
        ),
        cost_estimate=cost,
    )(x2d, w_t)

    return out2d.reshape(*lead, num_patches, N)


if __name__ == "__main__":
    # Small config consistent with the module.
    input_token_len = 16
    hidden_size = 32
    batch = 2
    seq_len = 64  # -> num_patches = 4

    key = jax.random.PRNGKey(0)
    k_x, k_w = jax.random.split(key)
    hidden_state = jax.random.normal(k_x, (batch, seq_len), dtype=jnp.float32)
    # Deterministic init of the Linear weight (hidden_size, input_token_len).
    weight = jax.random.normal(
        k_w, (hidden_size, input_token_len), dtype=jnp.float32
    ) * (1.0 / math.sqrt(input_token_len))

    # f32 path — exact-ish vs reference.
    out = timer_patch_embedding(hidden_state, weight, input_token_len)
    out = jax.block_until_ready(out)
    ref = hidden_state.reshape(batch, seq_len // input_token_len,
                               input_token_len) @ weight.T
    assert out.shape == (batch, seq_len // input_token_len, hidden_size)
    assert jnp.allclose(out, ref, atol=1e-5, rtol=1e-5)

    # Arbitrary leading dims (module supports (..., seq_len)).
    hs3 = jax.random.normal(k_x, (2, 3, seq_len), dtype=jnp.float32)
    out3 = jax.block_until_ready(
        timer_patch_embedding(hs3, weight, input_token_len))
    ref3 = hs3.reshape(2, 3, seq_len // input_token_len,
                       input_token_len) @ weight.T
    assert out3.shape == ref3.shape
    assert jnp.allclose(out3, ref3, atol=1e-5, rtol=1e-5)

    # bf16-compute path (bandwidth optimization) — looser tolerance.
    out_bf16 = jax.block_until_ready(
        timer_patch_embedding(hidden_state, weight, input_token_len,
                              compute_dtype=jnp.bfloat16))
    assert out_bf16.dtype == jnp.float32
    assert jnp.allclose(out_bf16, ref, atol=5e-2, rtol=5e-2)

    print("KERNEL_OK")
</pallas_src>

<mosaic_0001>
module attributes {stable_mosaic.version = 11 : i64} {
  func.func @_patch_embed_kernel(%arg0: i32, %arg1: i32, %arg2: memref<8x16xf32, #tpu.memory_space<vmem>>, %arg3: memref<16x32xf32, #tpu.memory_space<vmem>>, %arg4: memref<8x32xf32, #tpu.memory_space<vmem>>) attributes {dimension_semantics = [#tpu.dimension_semantics<parallel>, #tpu.dimension_semantics<parallel>], iteration_bounds = array<i64: 1, 1>, scalar_prefetch = 0 : i64, scratch_operands = 0 : i64, tpu.core_type = #tpu.core_type<tc>, window_params = [{transform_indices = @transform_0, window_bounds = array<i64: 8, 16>}, {transform_indices = @transform_1, window_bounds = array<i64: 16, 32>}, {transform_indices = @transform_2, window_bounds = array<i64: 8, 32>}]} {
    %c0 = arith.constant 0 : index
    %c0_0 = arith.constant 0 : index
    %0 = vector.load %arg2[%c0, %c0_0] : memref<8x16xf32, #tpu.memory_space<vmem>>, vector<8x16xf32>
    %c0_1 = arith.constant 0 : index
    %c0_2 = arith.constant 0 : index
    %1 = vector.load %arg3[%c0_1, %c0_2] : memref<16x32xf32, #tpu.memory_space<vmem>>, vector<16x32xf32>
    %cst = arith.constant dense<0.000000e+00> : vector<8x32xf32>
    %2 = tpu.matmul %0, %1, %cst {dimension_numbers = #tpu.dot_dimension_numbers<[1], [0], [0], [1], [0, 0, 1, 1], [], []>} : vector<8x16xf32>, vector<16x32xf32>, vector<8x32xf32> -> vector<8x32xf32>
    %c0_3 = arith.constant 0 : index
    %c0_4 = arith.constant 0 : index
    %3 = vector.load %arg4[%c0_3, %c0_4] : memref<8x32xf32, #tpu.memory_space<vmem>>, vector<8x32xf32>
    tpu.vector_store %arg4[%c0_3, %c0_4], %2 {strides = array<i32>} : memref<8x32xf32, #tpu.memory_space<vmem>>, vector<8x32xf32>,
    return
  }
  func.func @transform_0(%arg0: i32, %arg1: i32) -> (i32, i32) {
    %c0_i32 = arith.constant 0 : i32
    %c0_i32_0 = arith.constant 0 : i32
    return %arg0, %c0_i32 : i32, i32
  }
  func.func @transform_1(%arg0: i32, %arg1: i32) -> (i32, i32) {
    %c0_i32 = arith.constant 0 : i32
    %c0_i32_0 = arith.constant 0 : i32
    return %c0_i32, %arg1 : i32, i32
  }
  func.func @transform_2(%arg0: i32, %arg1: i32) -> (i32, i32) {
    %c0_i32 = arith.constant 0 : i32
    return %arg0, %arg1 : i32, i32
  }
}

</mosaic_0001>

<bundles_post_ra>
// kernel: tpu_custom_call.1
= control target key start
LH: loop header
LB: loop body
LE: loop exit
PB: predicated region body
PF: predicated region fallthrough
CT: control target
= control target key end

     0   :  { %7 = vsyncpa [#allocation3], 0  ;;  %s293_s0 = inlined_call_operand.hbm [shape: f32[8,16], index: 0, kind: input, shape index: {}]   ;;  %s294_s1 = inlined_call_operand.hbm [shape: f32[16,32], index: 1, kind: input, shape index: {}]   ;;  %s295_s2 = inlined_call_operand.hbm [shape: f32[8,32], index: 2, kind: output, shape index: {}]  }
   0x1   :  { %8 = vsyncpa [#allocation6], 0 }
   0x2   :  { %9 = vsyncpa [#allocation4], 0  ;;  %s227_s9 = smov [#allocation2]   ;;  %s228_s11 = smov [#allocation5]  }
   0x3   :  { %s16_s10 = sshll.u32 %s227_s9, 4  ;;  %s25_s12 = sshll.u32 %s228_s11, 4  ;;  %s17_s10 = int_to_ptr.vmem [resolvable:$true] %s16_s10  ;;  %s250_s12 = int_to_ptr.vmem [resolvable:$true] %s25_s12 }
   0x4   :  { %s155_s15 = scalar_lea.hbm %s293_s0, 128 }
   0x5   :  { %p156_p0 = scmp.ne.s32.totalorder %s293_s0, %s155_s15  ;;  %p159_p1 = scmp.lt.u32.totalorder %s155_s15, %s293_s0 }
   0x7   :  { %p161_p2 = pnand %p159_p1, %p156_p0 }
   0x9   :  { %164 = shalt.err (!%p161_p2)
}
   0xa   :  { %s165_s20 = scalar_lea.vmem %s17_s10, 128  ;;  %p170_p4 = scmp.lt.s32.totalorder %s17_s10, %s17_s10 }
   0xb   :  { %p166_p3 = scmp.ne.s32.totalorder %s17_s10, %s165_s20  ;;  %p171_p5 = scmp.lt.s32.totalorder %s165_s20, %s165_s20 }
   0xd   :  { %p172_p6 = por %p171_p5, %p170_p4 }
   0xf   :  { %p173_p7 = pnand %p172_p6, %p166_p3 }
  0x11   :  { %176 = shalt.err (!%p173_p7)
}
  0x12   :  { %19 = dma.hbm_to_vmem [thread:$0]  %s293_s0, 128, %s17_s10, [#allocation3]  }
  0x13   :  { %s177_s25 = scalar_lea.hbm %s294_s1, 256 }
  0x14   :  { %p178_p8 = scmp.ne.s32.totalorder %s294_s1, %s177_s25  ;;  %p181_p9 = scmp.lt.u32.totalorder %s177_s25, %s294_s1 }
  0x16   :  { %p183_p10 = pnand %p181_p9, %p178_p8 }
  0x18   :  { %186 = shalt.err (!%p183_p10)
}
  0x19   :  { %s187_s30 = scalar_lea.vmem %s250_s12, 256  ;;  %p192_p12 = scmp.lt.s32.totalorder %s250_s12, %s250_s12 }
  0x1a   :  { %p188_p11 = scmp.ne.s32.totalorder %s250_s12, %s187_s30  ;;  %p193_p13 = scmp.lt.s32.totalorder %s187_s30, %s187_s30 }
  0x1c   :  { %p194_p0 = por %p193_p13, %p192_p12 }
  0x1e   :  { %p195_p1 = pnand %p194_p0, %p188_p11 }
  0x20   :  { %198 = shalt.err (!%p195_p1)
}
  0x21   :  { %s229_s0 = smov 128   ;;  %s230_s3 = smov 8  }
  0x22   :  { %31 = dma.hbm_to_vmem [thread:$0]  %s294_s1, 256, %s250_s12, [#allocation6], %s229_s0, %s229_s0, %s230_s3  }
  0x23   :  { %221 = dma.done.wait [#allocation3], 128  }
  0x24   :  { %222 = vsyncadd [#allocation3], 4294967168 }
  0x25   :  { %223 = dma.done.wait [#allocation6], 256  }
  0x26   :  { %224 = vsyncadd [#allocation6], 4294967040  ;;  %v231_v0 = vmov 0.0|0.0   ;;  %vm232_vm0 = vmmov 0   ;;  %v233_v1 = vmov 0.0   ;;  %v39_v2 = vld [vmem:[#allocation5] sm:$0xff] }
  0x27   :  { %144 = vmatprep.subr.bf16.mxu0 %v231_v0  ;;  %141 = vmatprep.mubr.msk.f32.mxu0 %vm232_vm0, %v233_v1  ;;  %v40_v3 = vld [vmem:[#allocation5 + $0x8] sm:$0xff]  ;;  %v38_v5 = vld [vmem:[#allocation2] sm:$0xff]  ;;  %vm41_vm1 = vcmask 130048   ;;  %s234_s6 = smov [#allocation7]   ;;  %vm115_vm2 = vcmask 261120  }
  0x28   :  { %v145_v4 = vpack.c.bf16 %v40_v3, %v39_v2  ;;  %s123_s7 = sshll.u32 %s234_s6, 4  ;;  %s124_s7 = int_to_ptr.vmem [resolvable:$true] %s123_s7 }
  0x29   :  { %s199_s1 = scalar_lea.vmem %s124_s7, 128  ;;  %p204_p3 = scmp.lt.s32.totalorder %s124_s7, %s124_s7 }
  0x2a   :  { %146 = vmatpush3.bf16.msra.mxu0 %v145_v4  ;;  %p200_p2 = scmp.ne.s32.totalorder %s124_s7, %s199_s1  ;;  %p205_p4 = scmp.lt.s32.totalorder %s199_s1, %s199_s1 }
  0x2c   :  { %p206_p5 = por %p205_p4, %p204_p3 }
  0x2d   :  { %142 = vmatmul.mubr.msk.f32.vlgmr.msra.gmra.mrb[0].mxu0 %vm41_vm1, %v38_v5 }
  0x2e   :  { %p207_p6 = pnand %p206_p5, %p200_p2 }
 0x100   :  { %v111_v6 = vpop.f32.mrb[0].mxu0 }
 0x101   :  { %v143_v7 = vpop.f32.mrb[1].mxu0  ;;  %116 = vst.msk [vmem:[#allocation7] sm:$0xff] %vm115_vm2, %v111_v6 }
 0x102   :  { %210 = shalt.err (!%p207_p6)
}
 0x103   :  { %s211_s10 = scalar_lea.hbm %s295_s2, 128 }
 0x104   :  { %p212_p7 = scmp.ne.s32.totalorder %s295_s2, %s211_s10  ;;  %p215_p8 = scmp.lt.u32.totalorder %s211_s10, %s295_s2 }
 0x106   :  { %p217_p9 = pnand %p215_p8, %p212_p7 }
 0x108   :  { %220 = shalt.err (!%p217_p9)
}
 0x109   :  { %126 = dma.vmem_to_hbm [thread:$0]  %s124_s7, 128, %s295_s2, [#allocation4]  }
 0x10a   :  { %225 = dma.done.wait [#allocation4], 128  }
 0x10b   :  { %226 = vsyncadd [#allocation4], 4294967168 }
 0x10c   :  { %130 = vsyncpa [#allocation3], 1 }
 0x10d   :  { %131 = vsyncpa [#allocation6], 1 }
 0x10e   :  { %132 = vsyncpa [#allocation4], 1 }

</bundles_post_ra>
